<compile_context>
chip_gen: v6e
topology: v6e:2x2x1
jax: 0.10.0
libtpu: 0.0.40
codegen_flags: <defaults>
</compile_context>

<pallas_src>
import functools

import jax
import jax.numpy as jnp
from jax.experimental import pallas as pl
from jax.experimental.pallas import tpu as pltpu

LANE = 128


def mesh_network_peur_kernel(ap_ref, x_ref, g_ref, w_ref, b_ref, out_ref):
    f32 = jnp.float32
    bf16 = jnp.bfloat16

    def relu(v):
        return jnp.maximum(v, 0.0)

    def mm(a, b):
        # bf16 operands on the MXU, f32 accumulation (operands pre-cast).
        return jnp.dot(a, b, preferred_element_type=f32)

    n = g_ref.shape[0] // 2             # number of mesh nodes
    b_all = b_ref[...]                  # (8, 128) f32, one bias row per layer
    g = g_ref[...]                      # (2N, N*P) bf16 graph constants
    pool = g[0:n, :]                    # (N, N*P) per-patch mean-nodes pooling
    am = g[n:2 * n, 0:n]                # (N, N)   normalized mesh adjacency
    ap = ap_ref[...]                    # (N*P, N*P) block-diag patch adjacency

    def gconv(a, h_bf16, i):
        # GraphConv reassociated: relu(A @ (H @ W_i) + b_i); lanes padded to 128.
        hw = mm(h_bf16, w_ref[i]).astype(bf16)
        return relu(mm(a, hw) + b_all[i:i + 1, :])

    # ---- PatchEmbedder2ConvLayer over all spider patches (block-diag batch) ----
    h = gconv(ap, x_ref[...], 0)                      # (N*P, 128)
    h = gconv(ap, h.astype(bf16), 1)                  # (N*P, 128)
    r = mm(pool, h.astype(bf16))                      # (N, 128) per-patch mean

    # ---- GMReader2ConvUniversalReadout: two GraphConvs over the mesh graph ----
    h = gconv(am, r.astype(bf16), 2)                  # (N, 128)
    h = gconv(am, h.astype(bf16), 3)                  # (N, 128)

    # ---- UniversalReadout (deep sets): rho( mean_n phi(h_n) ) ----
    p = relu(mm(h.astype(bf16), w_ref[4]) + b_all[4:5, :])            # (N, 128)
    g_mean = jnp.sum(p, axis=0, keepdims=True) * (1.0 / p.shape[0])   # (1, 128)
    rr = relu(mm(g_mean.astype(bf16), w_ref[5]) + b_all[5:6, :])      # (1, 128)

    # ---- classifier into the lane-dense (1, 128) output block ----
    out_ref[...] = mm(rr.astype(bf16), w_ref[6]) + b_all[6:7, :]


def pack_params(params):
    """Pack 7 weight matrices / 7 bias rows into two lane-padded slabs (done once)."""
    def pad_w(w):
        out = jnp.zeros((LANE, LANE), jnp.float32)
        return out.at[:w.shape[0], :w.shape[1]].set(w)

    w_names = ["wp1", "wp2", "w1", "w2", "wphi", "wrho", "wc"]
    b_names = ["bp1", "bp2", "b1", "b2", "bphi", "brho", "bc"]
    w_slab = jnp.stack([pad_w(params[k]) for k in w_names]).astype(jnp.bfloat16)
    b_slab = jnp.zeros((8, LANE), jnp.float32)
    for i, k in enumerate(b_names):
        b = params[k].reshape(-1)
        b_slab = b_slab.at[i, :b.shape[0]].set(b)
    return w_slab, b_slab


def pack_graph_constants(a_mesh_norm, a_patch_norm):
    """Build per-mesh graph constants once (hoisted out of the per-call path)."""
    n, p, _ = a_patch_norm.shape
    # Block-diagonal batched spider-patch adjacency (dense equivalent of the DGL
    # GraphDataLoader batched graph), built with a single scatter.
    a_bd = jnp.zeros((n, p, n, p), jnp.float32)
    a_bd = a_bd.at[jnp.arange(n), :, jnp.arange(n), :].set(a_patch_norm)
    a_bd = a_bd.reshape(n * p, n * p).astype(jnp.bfloat16)
    # Per-patch mean-nodes readout as a pooling matmul + mesh adjacency, packed
    # into one (2N, N*P) buffer (fewer DMA descriptors).
    pool = jnp.repeat(jnp.eye(n, dtype=jnp.float32), p, axis=1) / float(p)
    gconst = jnp.zeros((2 * n, n * p), jnp.float32)
    gconst = gconst.at[0:n, :].set(pool)
    gconst = gconst.at[n:2 * n, 0:n].set(a_mesh_norm)
    return a_bd, gconst.astype(jnp.bfloat16)


@functools.partial(jax.jit, static_argnames=("out_feats",))
def mesh_network_peur_forward(a_bd, gconst, patches, w_slab, b_slab, out_feats):
    """MeshNetworkPEUR forward (eval mode) as one Pallas TPU kernel."""
    n_p = a_bd.shape[0]
    fp = patches.shape[-1]
    # Lane-pad the spider-patch node features to 128 and pre-cast to bf16.
    x = (jnp.zeros((n_p, LANE), jnp.float32)
         .at[:, :fp].set(patches.reshape(n_p, fp)).astype(jnp.bfloat16))

    vmem = pl.BlockSpec(memory_space=pltpu.MemorySpace.VMEM)
    out_pad = pl.pallas_call(
        mesh_network_peur_kernel,
        out_shape=jax.ShapeDtypeStruct((1, LANE), jnp.float32),
        in_specs=[vmem] * 5,
        out_specs=vmem,
    )(a_bd, x, gconst, w_slab, b_slab)
    return out_pad[:, :out_feats]


def _sym_norm(a):
    # Symmetric degree normalization D^-1/2 A D^-1/2 (works for (N,N) and (N,P,P)).
    # TODO(synk): DGL GraphConv(norm='both') normalizes by unweighted degrees;
    # weighted-degree normalization is used here as the dense equivalent.
    deg = jnp.sum(a, axis=-1)
    d = 1.0 / jnp.sqrt(jnp.maximum(deg, 1e-6))
    return a * d[..., :, None] * d[..., None, :]


def _linear_init(key, fan_in, fan_out):
    # Deterministic PyTorch-style uniform(-1/sqrt(fan_in), 1/sqrt(fan_in)) init.
    kw, kb = jax.random.split(key)
    s = 1.0 / jnp.sqrt(jnp.float32(fan_in))
    w = jax.random.uniform(kw, (fan_in, fan_out), jnp.float32, -s, s)
    b = jax.random.uniform(kb, (1, fan_out), jnp.float32, -s, s)
    return w, b


if __name__ == "__main__":
    key = jax.random.PRNGKey(0)
    (k_feat, k_pw, k_mw,
     kp1, kp2, k1, k2, k3, k4, k5) = jax.random.split(key, 10)

    # Small shapes consistent with the module.
    N, P = 16, 8                 # 16 mesh nodes, spider patches of 8 nodes
    in_dim = 4                   # per-node feature dim ('aggregated_feats')
    patch_hidden = in_dim * 16   # 64 (PatchEmbedder2ConvLayer hidden)
    readout_dim = 32
    hidden_dim = 32
    out_feats = 8

    # Spider-patch node features.
    # TODO(synk): the reference permutes patches (np.random.permutation) before
    # embedding; identity order is used here for determinism.
    patches = jax.random.normal(k_feat, (N, P, in_dim), jnp.float32)

    # Spider-patch graphs: ring + spokes to node 0, positive symmetric weights.
    idx_p = jnp.arange(P)
    ring_p = jnp.zeros((P, P)).at[idx_p, (idx_p + 1) % P].set(1.0)
    spoke_p = jnp.zeros((P, P)).at[0, idx_p].set(1.0).at[0, 0].set(0.0)
    mask_p = jnp.clip(ring_p + ring_p.T + spoke_p + spoke_p.T, 0.0, 1.0)
    wpat = jnp.abs(jax.random.normal(k_pw, (N, P, P), jnp.float32)) + 0.1
    a_patch = mask_p[None, :, :] * 0.5 * (wpat + jnp.swapaxes(wpat, 1, 2))
    a_patch_norm = _sym_norm(a_patch)

    # Mesh graph: ring + chord connectivity, positive symmetric edge weights.
    idx = jnp.arange(N)
    ring = jnp.zeros((N, N)).at[idx, (idx + 1) % N].set(1.0)
    chord = jnp.zeros((N, N)).at[idx, (idx + 4) % N].set(1.0)
    mask = jnp.clip(ring + ring.T + chord + chord.T, 0.0, 1.0)
    wm = jnp.abs(jax.random.normal(k_mw, (N, N), jnp.float32)) + 0.1
    a_mesh_norm = _sym_norm(mask * 0.5 * (wm + wm.T))

    # Parameters (deterministic init).
    # TODO(synk): PatchEmbedder2ConvLayer internals (two GraphConv + ReLU +
    # dropout + mean-nodes readout) are assumed; its class body is not in the spec.
    wp1, bp1 = _linear_init(kp1, in_dim, patch_hidden)       # patch GraphConv 1
    wp2, bp2 = _linear_init(kp2, patch_hidden, readout_dim)  # patch GraphConv 2
    w1, b1 = _linear_init(k1, readout_dim, hidden_dim)       # mesh GraphConv 1
    w2, b2 = _linear_init(k2, hidden_dim, hidden_dim)        # mesh GraphConv 2
    wphi, bphi = _linear_init(k3, hidden_dim, hidden_dim)    # UniversalReadout phi
    wrho, brho = _linear_init(k4, hidden_dim, hidden_dim)    # UniversalReadout rho
    wc, bc = _linear_init(k5, hidden_dim, out_feats)         # classifier
    params = dict(wp1=wp1, bp1=bp1, wp2=wp2, bp2=bp2,
                  w1=w1, b1=b1, w2=w2, b2=b2,
                  wphi=wphi, bphi=bphi, wrho=wrho, brho=brho,
                  wc=wc, bc=bc)

    # One-time packing (hoisted out of the per-call path).
    w_slab, b_slab = pack_params(params)
    a_bd, gconst = pack_graph_constants(a_mesh_norm, a_patch_norm)

    out = mesh_network_peur_forward(a_bd, gconst, patches, w_slab, b_slab,
                                    out_feats)
    out = jax.block_until_ready(out)
    assert out.shape == (1, out_feats)
    assert jnp.all(jnp.isfinite(out))
    print("KERNEL_OK")
</pallas_src>

<mosaic_0001>
module attributes {stable_mosaic.version = 11 : i64} {
  func.func @mesh_network_peur_kernel(%arg0: memref<128x128xbf16, #tpu.memory_space<vmem>>, %arg1: memref<128x128xbf16, #tpu.memory_space<vmem>>, %arg2: memref<32x128xbf16, #tpu.memory_space<vmem>>, %arg3: memref<7x128x128xbf16, #tpu.memory_space<vmem>>, %arg4: memref<8x128xf32, #tpu.memory_space<vmem>>, %arg5: memref<1x128xf32, #tpu.memory_space<vmem>>) attributes {dimension_semantics = [], scalar_prefetch = 0 : i64, scratch_operands = 0 : i64, tpu.core_type = #tpu.core_type<tc>} {
    %c0 = arith.constant 0 : index
    %c0_0 = arith.constant 0 : index
    %0 = vector.load %arg4[%c0, %c0_0] : memref<8x128xf32, #tpu.memory_space<vmem>>, vector<8x128xf32>
    %c0_1 = arith.constant 0 : index
    %c0_2 = arith.constant 0 : index
    %1 = vector.load %arg2[%c0_1, %c0_2] : memref<32x128xbf16, #tpu.memory_space<vmem>>, vector<32x128xbf16>
    %2 = vector.extract_strided_slice %1 {offsets = [0, 0], sizes = [16, 128], strides = [1, 1]} : vector<32x128xbf16> to vector<16x128xbf16>
    %3 = vector.extract_strided_slice %1 {offsets = [16, 0], sizes = [16, 16], strides = [1, 1]} : vector<32x128xbf16> to vector<16x16xbf16>
    %c0_3 = arith.constant 0 : index
    %c0_4 = arith.constant 0 : index
    %4 = vector.load %arg0[%c0_3, %c0_4] : memref<128x128xbf16, #tpu.memory_space<vmem>>, vector<128x128xbf16>
    %c0_5 = arith.constant 0 : index
    %c0_6 = arith.constant 0 : index
    %5 = vector.load %arg1[%c0_5, %c0_6] : memref<128x128xbf16, #tpu.memory_space<vmem>>, vector<128x128xbf16>
    %c0_7 = arith.constant 0 : index
    %c0_8 = arith.constant 0 : index
    %c0_9 = arith.constant 0 : index
    %6 = vector.load %arg3[%c0_7, %c0_8, %c0_9] : memref<7x128x128xbf16, #tpu.memory_space<vmem>>, vector<1x128x128xbf16>
    %7 = vector.shape_cast %6 : vector<1x128x128xbf16> to vector<128x128xbf16>
    %cst = arith.constant dense<0.000000e+00> : vector<128x128xf32>
    %8 = tpu.matmul %5, %7, %cst {dimension_numbers = #tpu.dot_dimension_numbers<[1], [0], [0], [1], [0, 0, 1, 1], [], []>} : vector<128x128xbf16>, vector<128x128xbf16>, vector<128x128xf32> -> vector<128x128xf32>
    %9 = arith.truncf %8 : vector<128x128xf32> to vector<128x128xbf16>
    %cst_10 = arith.constant dense<0.000000e+00> : vector<128x128xf32>
    %10 = tpu.matmul %4, %9, %cst_10 {dimension_numbers = #tpu.dot_dimension_numbers<[1], [0], [0], [1], [0, 0, 1, 1], [], []>} : vector<128x128xbf16>, vector<128x128xbf16>, vector<128x128xf32> -> vector<128x128xf32>
    %11 = vector.extract_strided_slice %0 {offsets = [0, 0], sizes = [1, 128], strides = [1, 1]} : vector<8x128xf32> to vector<1x128xf32>
    %12 = vector.broadcast %11 : vector<1x128xf32> to vector<128x128xf32>
    %13 = arith.addf %10, %12 : vector<128x128xf32>
    %cst_11 = arith.constant 0.000000e+00 : f32
    %14 = vector.broadcast %cst_11 : f32 to vector<128x128xf32>
    %15 = arith.maximumf %13, %14 : vector<128x128xf32>
    %16 = arith.truncf %15 : vector<128x128xf32> to vector<128x128xbf16>
    %c1 = arith.constant 1 : index
    %c0_12 = arith.constant 0 : index
    %c0_13 = arith.constant 0 : index
    %17 = vector.load %arg3[%c1, %c0_12, %c0_13] : memref<7x128x128xbf16, #tpu.memory_space<vmem>>, vector<1x128x128xbf16>
    %18 = vector.shape_cast %17 : vector<1x128x128xbf16> to vector<128x128xbf16>
    %cst_14 = arith.constant dense<0.000000e+00> : vector<128x128xf32>
    %19 = tpu.matmul %16, %18, %cst_14 {dimension_numbers = #tpu.dot_dimension_numbers<[1], [0], [0], [1], [0, 0, 1, 1], [], []>} : vector<128x128xbf16>, vector<128x128xbf16>, vector<128x128xf32> -> vector<128x128xf32>
    %20 = arith.truncf %19 : vector<128x128xf32> to vector<128x128xbf16>
    %cst_15 = arith.constant dense<0.000000e+00> : vector<128x128xf32>
    %21 = tpu.matmul %4, %20, %cst_15 {dimension_numbers = #tpu.dot_dimension_numbers<[1], [0], [0], [1], [0, 0, 1, 1], [], []>} : vector<128x128xbf16>, vector<128x128xbf16>, vector<128x128xf32> -> vector<128x128xf32>
    %22 = vector.extract_strided_slice %0 {offsets = [1, 0], sizes = [1, 128], strides = [1, 1]} : vector<8x128xf32> to vector<1x128xf32>
    %23 = vector.broadcast %22 : vector<1x128xf32> to vector<128x128xf32>
    %24 = arith.addf %21, %23 : vector<128x128xf32>
    %cst_16 = arith.constant 0.000000e+00 : f32
    %25 = vector.broadcast %cst_16 : f32 to vector<128x128xf32>
    %26 = arith.maximumf %24, %25 : vector<128x128xf32>
    %27 = arith.truncf %26 : vector<128x128xf32> to vector<128x128xbf16>
    %cst_17 = arith.constant dense<0.000000e+00> : vector<16x128xf32>
    %28 = tpu.matmul %2, %27, %cst_17 {dimension_numbers = #tpu.dot_dimension_numbers<[1], [0], [0], [1], [0, 0, 1, 1], [], []>} : vector<16x128xbf16>, vector<128x128xbf16>, vector<16x128xf32> -> vector<16x128xf32>
    %29 = arith.truncf %28 : vector<16x128xf32> to vector<16x128xbf16>
    %c2 = arith.constant 2 : index
    %c0_18 = arith.constant 0 : index
    %c0_19 = arith.constant 0 : index
    %30 = vector.load %arg3[%c2, %c0_18, %c0_19] : memref<7x128x128xbf16, #tpu.memory_space<vmem>>, vector<1x128x128xbf16>
    %31 = vector.shape_cast %30 : vector<1x128x128xbf16> to vector<128x128xbf16>
    %cst_20 = arith.constant dense<0.000000e+00> : vector<16x128xf32>
    %32 = tpu.matmul %29, %31, %cst_20 {dimension_numbers = #tpu.dot_dimension_numbers<[1], [0], [0], [1], [0, 0, 1, 1], [], []>} : vector<16x128xbf16>, vector<128x128xbf16>, vector<16x128xf32> -> vector<16x128xf32>
    %33 = arith.truncf %32 : vector<16x128xf32> to vector<16x128xbf16>
    %cst_21 = arith.constant dense<0.000000e+00> : vector<16x128xf32>
    %34 = tpu.matmul %3, %33, %cst_21 {dimension_numbers = #tpu.dot_dimension_numbers<[1], [0], [0], [1], [0, 0, 1, 1], [], []>} : vector<16x16xbf16>, vector<16x128xbf16>, vector<16x128xf32> -> vector<16x128xf32>
    %35 = vector.extract_strided_slice %0 {offsets = [2, 0], sizes = [1, 128], strides = [1, 1]} : vector<8x128xf32> to vector<1x128xf32>
    %36 = vector.broadcast %35 : vector<1x128xf32> to vector<16x128xf32>
    %37 = arith.addf %34, %36 : vector<16x128xf32>
    %cst_22 = arith.constant 0.000000e+00 : f32
    %38 = vector.broadcast %cst_22 : f32 to vector<16x128xf32>
    %39 = arith.maximumf %37, %38 : vector<16x128xf32>
    %40 = arith.truncf %39 : vector<16x128xf32> to vector<16x128xbf16>
    %c3 = arith.constant 3 : index
    %c0_23 = arith.constant 0 : index
    %c0_24 = arith.constant 0 : index
    %41 = vector.load %arg3[%c3, %c0_23, %c0_24] : memref<7x128x128xbf16, #tpu.memory_space<vmem>>, vector<1x128x128xbf16>
    %42 = vector.shape_cast %41 : vector<1x128x128xbf16> to vector<128x128xbf16>
    %cst_25 = arith.constant dense<0.000000e+00> : vector<16x128xf32>
    %43 = tpu.matmul %40, %42, %cst_25 {dimension_numbers = #tpu.dot_dimension_numbers<[1], [0], [0], [1], [0, 0, 1, 1], [], []>} : vector<16x128xbf16>, vector<128x128xbf16>, vector<16x128xf32> -> vector<16x128xf32>
    %44 = arith.truncf %43 : vector<16x128xf32> to vector<16x128xbf16>
    %cst_26 = arith.constant dense<0.000000e+00> : vector<16x128xf32>
    %45 = tpu.matmul %3, %44, %cst_26 {dimension_numbers = #tpu.dot_dimension_numbers<[1], [0], [0], [1], [0, 0, 1, 1], [], []>} : vector<16x16xbf16>, vector<16x128xbf16>, vector<16x128xf32> -> vector<16x128xf32>
    %46 = vector.extract_strided_slice %0 {offsets = [3, 0], sizes = [1, 128], strides = [1, 1]} : vector<8x128xf32> to vector<1x128xf32>
    %47 = vector.broadcast %46 : vector<1x128xf32> to vector<16x128xf32>
    %48 = arith.addf %45, %47 : vector<16x128xf32>
    %cst_27 = arith.constant 0.000000e+00 : f32
    %49 = vector.broadcast %cst_27 : f32 to vector<16x128xf32>
    %50 = arith.maximumf %48, %49 : vector<16x128xf32>
    %51 = arith.truncf %50 : vector<16x128xf32> to vector<16x128xbf16>
    %c4 = arith.constant 4 : index
    %c0_28 = arith.constant 0 : index
    %c0_29 = arith.constant 0 : index
    %52 = vector.load %arg3[%c4, %c0_28, %c0_29] : memref<7x128x128xbf16, #tpu.memory_space<vmem>>, vector<1x128x128xbf16>
    %53 = vector.shape_cast %52 : vector<1x128x128xbf16> to vector<128x128xbf16>
    %cst_30 = arith.constant dense<0.000000e+00> : vector<16x128xf32>
    %54 = tpu.matmul %51, %53, %cst_30 {dimension_numbers = #tpu.dot_dimension_numbers<[1], [0], [0], [1], [0, 0, 1, 1], [], []>} : vector<16x128xbf16>, vector<128x128xbf16>, vector<16x128xf32> -> vector<16x128xf32>
    %55 = vector.extract_strided_slice %0 {offsets = [4, 0], sizes = [1, 128], strides = [1, 1]} : vector<8x128xf32> to vector<1x128xf32>
    %56 = vector.broadcast %55 : vector<1x128xf32> to vector<16x128xf32>
    %57 = arith.addf %54, %56 : vector<16x128xf32>
    %cst_31 = arith.constant 0.000000e+00 : f32
    %58 = vector.broadcast %cst_31 : f32 to vector<16x128xf32>
    %59 = arith.maximumf %57, %58 : vector<16x128xf32>
    %cst_32 = arith.constant dense<0.000000e+00> : vector<128xf32>
    %60 = vector.multi_reduction <add>, %59, %cst_32 [0] : vector<16x128xf32> to vector<128xf32>
    %61 = vector.shape_cast %60 : vector<128xf32> to vector<1x128xf32>
    %cst_33 = arith.constant 6.250000e-02 : f32
    %62 = vector.broadcast %cst_33 : f32 to vector<1x128xf32>
    %63 = arith.mulf %61, %62 : vector<1x128xf32>
    %64 = arith.truncf %63 : vector<1x128xf32> to vector<1x128xbf16>
    %c5 = arith.constant 5 : index
    %c0_34 = arith.constant 0 : index
    %c0_35 = arith.constant 0 : index
    %65 = vector.load %arg3[%c5, %c0_34, %c0_35] : memref<7x128x128xbf16, #tpu.memory_space<vmem>>, vector<1x128x128xbf16>
    %66 = vector.shape_cast %65 : vector<1x128x128xbf16> to vector<128x128xbf16>
    %cst_36 = arith.constant dense<0.000000e+00> : vector<1x128xf32>
    %67 = tpu.matmul %64, %66, %cst_36 {dimension_numbers = #tpu.dot_dimension_numbers<[1], [0], [0], [1], [0, 0, 1, 1], [], []>} : vector<1x128xbf16>, vector<128x128xbf16>, vector<1x128xf32> -> vector<1x128xf32>
    %68 = vector.extract_strided_slice %0 {offsets = [5, 0], sizes = [1, 128], strides = [1, 1]} : vector<8x128xf32> to vector<1x128xf32>
    %69 = arith.addf %67, %68 : vector<1x128xf32>
    %cst_37 = arith.constant 0.000000e+00 : f32
    %70 = vector.broadcast %cst_37 : f32 to vector<1x128xf32>
    %71 = arith.maximumf %69, %70 : vector<1x128xf32>
    %72 = arith.truncf %71 : vector<1x128xf32> to vector<1x128xbf16>
    %c6 = arith.constant 6 : index
    %c0_38 = arith.constant 0 : index
    %c0_39 = arith.constant 0 : index
    %73 = vector.load %arg3[%c6, %c0_38, %c0_39] : memref<7x128x128xbf16, #tpu.memory_space<vmem>>, vector<1x128x128xbf16>
    %74 = vector.shape_cast %73 : vector<1x128x128xbf16> to vector<128x128xbf16>
    %cst_40 = arith.constant dense<0.000000e+00> : vector<1x128xf32>
    %75 = tpu.matmul %72, %74, %cst_40 {dimension_numbers = #tpu.dot_dimension_numbers<[1], [0], [0], [1], [0, 0, 1, 1], [], []>} : vector<1x128xbf16>, vector<128x128xbf16>, vector<1x128xf32> -> vector<1x128xf32>
    %76 = vector.extract_strided_slice %0 {offsets = [6, 0], sizes = [1, 128], strides = [1, 1]} : vector<8x128xf32> to vector<1x128xf32>
    %77 = arith.addf %75, %76 : vector<1x128xf32>
    %c0_41 = arith.constant 0 : index
    %c0_42 = arith.constant 0 : index
    %78 = vector.load %arg5[%c0_41, %c0_42] : memref<1x128xf32, #tpu.memory_space<vmem>>, vector<1x128xf32>
    tpu.vector_store %arg5[%c0_41, %c0_42], %77 {strides = array<i32>} : memref<1x128xf32, #tpu.memory_space<vmem>>, vector<1x128xf32>,
    return
  }
}

</mosaic_0001>

<bundles_post_ra>
// kernel: mesh_network_peur_forward.1
= control target key start
LH: loop header
LB: loop body
LE: loop exit
PB: predicated region body
PF: predicated region fallthrough
CT: control target
= control target key end

     0   :  { %10 = vsyncpa [#allocation3], 0  ;;  %s2276_s0 = inlined_call_operand.vmem [shape: bf16[128,128], index: 0, kind: input, shape index: {}]   ;;  %s2277_s1 = inlined_call_operand.vmem [shape: bf16[128,128], index: 1, kind: input, shape index: {}]   ;;  %s2278_s2 = inlined_call_operand.vmem [shape: bf16[32,128], index: 2, kind: input, shape index: {}]   ;;  %s2279_s3 = inlined_call_operand.hbm [shape: bf16[7,128,128], index: 3, kind: input, shape index: {}]   ;;  %s2280_s4 = inlined_call_operand.vmem [shape: f32[8,128], index: 4, kind: input, shape index: {}]   ;;  %s2281_s5 = inlined_call_operand.hbm [shape: f32[1,128], index: 5, kind: output, shape index: {}]  }
   0x1   :  { %11 = vsyncpa [#allocation4], 0  ;;  %s2061_s18 = smov [#allocation2]  }
   0x2   :  { %s23_s19 = sshll.u32 %s2061_s18, 4  ;;  %s24_s19 = int_to_ptr.vmem [resolvable:$true] %s23_s19 }
   0x3   :  { %s2025_s20 = scalar_lea.vmem %s24_s19, 7168  ;;  %p2030_p1 = scmp.lt.s32.totalorder %s24_s19, %s24_s19 }
   0x4   :  { %p2026_p0 = scmp.ne.s32.totalorder %s24_s19, %s2025_s20  ;;  %p2031_p2 = scmp.lt.s32.totalorder %s2025_s20, %s2025_s20 }
   0x6   :  { %p2032_p3 = por %p2031_p2, %p2030_p1 }
   0x8   :  { %p2033_p4 = pnand %p2032_p3, %p2026_p0 }
   0xa   :  { %2036 = shalt.err (!%p2033_p4)
}
   0xb   :  { %s2062_s21 = smov 64   ;;  %s2063_s22 = smov 4  }
   0xc   :  { %29 = dma.hbm_to_vmem [thread:$0]  %s2279_s3, 7168, %s24_s19, [#allocation3], %s2062_s21, %s2062_s21, %s2063_s22  }
   0xd   :  { %2057 = dma.done.wait [#allocation3], 7168  }
   0xe   :  { %2058 = vsyncadd [#allocation3], 4294960128  ;;  %v1943_v0 = vld [vmem:[#allocation2 + $0x38] sm:$0xff]   ;;  %v1944_v1 = vld [vmem:[#allocation2 + $0x30] sm:$0xff]   ;;  %v290_v56 = vlaneseq  ;;  %vm2065_vm0 = vmmov 0   ;;  %vm922_vm1 = vcmask 130048  }
   0xf   :  { %1677 = vmatprep.subr.bf16.mxu0 %v1943_v0  ;;  %v1945_v2 = vld [vmem:[#allocation2 + $0x28] sm:$0xff]   ;;  %v1946_v3 = vld [vmem:[#allocation2 + $0x20] sm:$0xff]   ;;  %v1947_v5 = vld [vmem:[#allocation2 + $0x18] sm:$0xff]  }
  0x10   :  { %1678 = vmatpush3.bf16.msra.mxu0 %v1943_v0  ;;  %v1951_v4 = vld [vmem:[%s2277_s1] sm:$0xff]   ;;  %v1948_v6 = vld [vmem:[#allocation2 + $0x10] sm:$0xff]   ;;  %v1949_v7 = vld [vmem:[#allocation2 + $0x8] sm:$0xff]   ;;  %v2173_v57 = vshrl.u32 %v290_v56, 7 }
  0x11   :  { %1679 = vmatprep.subr.bf16.mxu0 %v1944_v1  ;;  %1693 = vmatprep.mubr.bf16.mxu0 %v1951_v4  ;;  %v1950_v8 = vld [vmem:[#allocation2] sm:$0xff]   ;;  %v1952_v9 = vld [vmem:[%s2277_s1 + $0x8] sm:$0xff]   ;;  %v1953_v10 = vld [vmem:[%s2277_s1 + $0x10] sm:$0xff]  }
  0x12   :  { %v1954_v11 = vld [vmem:[%s2277_s1 + $0x18] sm:$0xff]   ;;  %v1955_v12 = vld [vmem:[%s2277_s1 + $0x20] sm:$0xff]   ;;  %v1956_v13 = vld [vmem:[%s2277_s1 + $0x28] sm:$0xff]   ;;  %v292_v58 = vsub.s32 0, %v2173_v57 }
  0x13   :  { %v1957_v14 = vld [vmem:[%s2277_s1 + $0x30] sm:$0xff]   ;;  %v1958_v15 = vld [vmem:[%s2277_s1 + $0x38] sm:$0xff]   ;;  %v2127_v16 = vld [vmem:[%s2276_s0] sm:$0xff]  }
  0x14   :  { %1680 = vmatpush3.bf16.msra.mxu0 %v1944_v1  ;;  %1725 = vmatprep.mubr.bf16.mxu1 %v2127_v16  ;;  %v1967_v17 = vld [vmem:[#allocation2 + $0x78] sm:$0xff]   ;;  %v1968_v18 = vld [vmem:[#allocation2 + $0x70] sm:$0xff]   ;;  %v1969_v19 = vld [vmem:[#allocation2 + $0x68] sm:$0xff]  }
  0x15   :  { %1681 = vmatprep.subr.bf16.mxu0 %v1945_v2  ;;  %v1970_v20 = vld [vmem:[#allocation2 + $0x60] sm:$0xff]   ;;  %v1971_v21 = vld [vmem:[#allocation2 + $0x58] sm:$0xff]   ;;  %v2133_v46 = vld [vmem:[%s2276_s0 + $0x8] sm:$0xff]  }
  0x16   :  { %v2138_v47 = vld [vmem:[%s2276_s0 + $0x10] sm:$0xff]   ;;  %v2145_v48 = vld [vmem:[%s2276_s0 + $0x18] sm:$0xff]   ;;  %v2150_v49 = vld [vmem:[%s2276_s0 + $0x20] sm:$0xff]  }
  0x17   :  { %v2157_v50 = vld [vmem:[%s2276_s0 + $0x28] sm:$0xff]   ;;  %v2162_v51 = vld [vmem:[%s2276_s0 + $0x30] sm:$0xff]   ;;  %v2169_v52 = vld [vmem:[%s2276_s0 + $0x38] sm:$0xff]  }
  0x18   :  { %1682 = vmatpush3.bf16.msra.mxu0 %v1945_v2  ;;  %v1972_v53 = vld [vmem:[#allocation2 + $0x50] sm:$0xff]   ;;  %v1973_v54 = vld [vmem:[#allocation2 + $0x48] sm:$0xff]   ;;  %v1974_v55 = vld [vmem:[#allocation2 + $0x40] sm:$0xff]  }
  0x19   :  { %1683 = vmatprep.subr.bf16.mxu0 %v1946_v3  ;;  %v2179_v59 = vld [vmem:[%s2280_s4] sm:$0xff] }
  0x1a   :  { %v293_v61 = vrot.slane %v2179_v59, %v292_v58 }
  0x1c   :  { %1684 = vmatpush3.bf16.msra.mxu0 %v1946_v3 }
  0x1d   :  { %1685 = vmatprep.subr.bf16.mxu0 %v1947_v5 }
  0x20   :  { %1686 = vmatpush3.bf16.msra.mxu0 %v1947_v5 }
  0x21   :  { %1687 = vmatprep.subr.bf16.mxu0 %v1948_v6 }
  0x24   :  { %1688 = vmatpush3.bf16.msra.mxu0 %v1948_v6 }
  0x25   :  { %1689 = vmatprep.subr.bf16.mxu0 %v1949_v7 }
  0x28   :  { %1690 = vmatpush3.bf16.msra.mxu0 %v1949_v7 }
  0x29   :  { %1691 = vmatprep.subr.bf16.mxu0 %v1950_v8 }
  0x2c   :  { %1692 = vmatpush3.bf16.msra.mxu0 %v1950_v8 }
  0x2d   :  { %1741 = vmatprep.subr.bf16.mxu0 %v1967_v17 }
  0x2f   :  { %1694 = vmatmul.mubr.bf16.vlgmr.msra.gmra.mxu0 %v1952_v9 }
  0x30   :  { %1697 = vmatprep.mubr.bf16.mxu0 %v1953_v10  ;;  %1742 = vmatpush3.bf16.msra.mxu0 %v1967_v17 }
  0x31   :  { %1743 = vmatprep.subr.bf16.mxu0 %v1968_v18 }
  0x34   :  { %1744 = vmatpush3.bf16.msra.mxu0 %v1968_v18 }
  0x35   :  { %1745 = vmatprep.subr.bf16.mxu0 %v1969_v19 }
  0x37   :  { %1698 = vmatmul.mubr.bf16.gmra.mxu0 %v1954_v11 }
  0x38   :  { %1701 = vmatprep.mubr.bf16.mxu0 %v1955_v12  ;;  %1746 = vmatpush3.bf16.msra.mxu0 %v1969_v19 }
  0x39   :  { %1747 = vmatprep.subr.bf16.mxu0 %v1970_v20 }
  0x3c   :  { %1748 = vmatpush3.bf16.msra.mxu0 %v1970_v20 }
  0x3d   :  { %1749 = vmatprep.subr.bf16.mxu0 %v1971_v21 }
  0x3f   :  { %1702 = vmatmul.mubr.bf16.gmra.mxu0 %v1956_v13 }
  0x40   :  { %1705 = vmatprep.mubr.bf16.mxu0 %v1957_v14  ;;  %1750 = vmatpush3.bf16.msra.mxu0 %v1971_v21 }
  0x41   :  { %1751 = vmatprep.subr.bf16.mxu0 %v1972_v53 }
  0x44   :  { %1752 = vmatpush3.bf16.msra.mxu0 %v1972_v53 }
  0x45   :  { %1753 = vmatprep.subr.bf16.mxu0 %v1973_v54 }
  0x47   :  { %1706 = vmatmul.mubr.bf16.gmra.mxu0 %v1958_v15 }
  0x48   :  { %1754 = vmatpush3.bf16.msra.mxu0 %v1973_v54 }
  0x49   :  { %1755 = vmatprep.subr.bf16.mxu0 %v1974_v55 }
  0x4c   :  { %1756 = vmatpush3.bf16.msra.mxu0 %v1974_v55 }
  0xef   :  { %v1695_v22 = vpop.f32.mrf.mxu0 }
  0xf1   :  { %v219_v23 = vpop.f32.mrf.mxu0 }
  0xf3   :  { %v1696_v24 = vpop.f32.mrf.mxu0 }
  0xf4   :  { %v283_v44 = vpack.c.bf16 %v1696_v24, %v1695_v22 }
  0xf5   :  { %v222_v25 = vpop.f32.mrf.mxu0 }
  0xf6   :  { %v282_v45 = vpack.c.bf16 %v222_v25, %v219_v23 }
  0xf7   :  { %v1699_v26 = vpop.f32.mrf.mxu0 }
  0xf9   :  { %v235_v27 = vpop.f32.mrf.mxu0 }
  0xfb   :  { %v1700_v28 = vpop.f32.mrf.mxu0 }
  0xfc   :  { %v285_v42 = vpack.c.bf16 %v1700_v28, %v1699_v26 }
  0xfd   :  { %v238_v29 = vpop.f32.mrf.mxu0 }
  0xfe   :  { %v284_v43 = vpack.c.bf16 %v238_v29, %v235_v27 }
  0xff   :  { %v1703_v30 = vpop.f32.mrf.mxu0 }
 0x101   :  { %v251_v31 = vpop.f32.mrf.mxu0 }
 0x103   :  { %v1704_v32 = vpop.f32.mrf.mxu0 }
 0x104   :  { %v287_v40 = vpack.c.bf16 %v1704_v32, %v1703_v30 }
 0x105   :  { %v254_v33 = vpop.f32.mrf.mxu0 }
 0x106   :  { %v286_v41 = vpack.c.bf16 %v254_v33, %v251_v31 }
 0x107   :  { %v1707_v34 = vpop.f32.mrf.mxu0 }
 0x109   :  { %v267_v35 = vpop.f32.mrf.mxu0 }
 0x10b   :  { %v1708_v36 = vpop.f32.mrf.mxu0 }
 0x10c   :  { %v289_v37 = vpack.c.bf16 %v1708_v36, %v1707_v34 }
 0x10d   :  { %v270_v38 = vpop.f32.mrf.mxu0 }
 0x10e   :  { %v288_v39 = vpack.c.bf16 %v270_v38, %v267_v35  ;;  %1709 = vmatprep.subr.bf16.mxu1 %v289_v37 }
 0x10f   :  { %1710 = vmatpush3.bf16.msra.mxu1 %v289_v37 }
 0x110   :  { %1711 = vmatprep.subr.bf16.mxu1 %v288_v39 }
 0x113   :  { %1712 = vmatpush3.bf16.msra.mxu1 %v288_v39 }
 0x114   :  { %1713 = vmatprep.subr.bf16.mxu1 %v287_v40 }
 0x117   :  { %1714 = vmatpush3.bf16.msra.mxu1 %v287_v40 }
 0x118   :  { %1715 = vmatprep.subr.bf16.mxu1 %v286_v41 }
 0x11b   :  { %1716 = vmatpush3.bf16.msra.mxu1 %v286_v41 }
 0x11c   :  { %1717 = vmatprep.subr.bf16.mxu1 %v285_v42 }
 0x11f   :  { %1718 = vmatpush3.bf16.msra.mxu1 %v285_v42 }
 0x120   :  { %1719 = vmatprep.subr.bf16.mxu1 %v284_v43 }
 0x123   :  { %1720 = vmatpush3.bf16.msra.mxu1 %v284_v43 }
 0x124   :  { %1721 = vmatprep.subr.bf16.mxu1 %v283_v44 }
 0x127   :  { %1722 = vmatpush3.bf16.msra.mxu1 %v283_v44 }
 0x128   :  { %1723 = vmatprep.subr.bf16.mxu1 %v282_v45 }
 0x12b   :  { %1724 = vmatpush3.bf16.msra.mxu1 %v282_v45 }
 0x12e   :  { %1726 = vmatmul.mubr.bf16.vlgmr.msra.gmra.mxu1 %v2133_v46 }
 0x12f   :  { %1729 = vmatprep.mubr.bf16.mxu1 %v2138_v47 }
 0x136   :  { %1730 = vmatmul.mubr.bf16.gmra.mxu1 %v2145_v48 }
 0x137   :  { %1733 = vmatprep.mubr.bf16.mxu1 %v2150_v49 }
 0x13e   :  { %1734 = vmatmul.mubr.bf16.gmra.mxu1 %v2157_v50 }
 0x13f   :  { %1737 = vmatprep.mubr.bf16.mxu1 %v2162_v51 }
 0x146   :  { %1738 = vmatmul.mubr.bf16.gmra.mxu1 %v2169_v52 }
 0x147   :  { %1789 = vmatprep.mubr.bf16.mxu1 %v2127_v16 }
 0x1ee   :  { %v1727_v60 = vpop.f32.mrf.mxu1 }
 0x1ef   :  { %v385_v2 = vadd.f32 %v1727_v60, %v293_v61 }
 0x1f0   :  { %v376_v62 = vpop.f32.mrf.mxu1 }
 0x1f1   :  { %v377_v0 = vadd.f32 %v376_v62, %v293_v61  ;;  %v441_v9 = vmax.f32 %v385_v2, 0.0 }
 0x1f2   :  { %v1728_v63 = vpop.f32.mrf.mxu1 }
 0x1f3   :  { %v388_v1 = vadd.f32 %v1728_v63, %v293_v61  ;;  %v439_v7 = vmax.f32 %v377_v0, 0.0 }
 0x1f4   :  { %v379_v3 = vpop.f32.mrf.mxu1 }
 0x1f5   :  { %v380_v4 = vadd.f32 %v379_v3, %v293_v61  ;;  %v442_v5 = vmax.f32 %v388_v1, 0.0 }
 0x1f6   :  { %v1731_v6 = vpop.f32.mrf.mxu1 }
 0x1f7   :  { %v440_v8 = vmax.f32 %v380_v4, 0.0  ;;  %v456_v12 = vpack.c.bf16 %v442_v5, %v441_v9  ;;  %v401_v16 = vadd.f32 %v1731_v6, %v293_v61 }
 0x1f8   :  { %v392_v10 = vpop.f32.mrf.mxu1 }
 0x1f9   :  { %v455_v11 = vpack.c.bf16 %v440_v8, %v439_v7  ;;  %v393_v14 = vadd.f32 %v392_v10, %v293_v61  ;;  %v445_v23 = vmax.f32 %v401_v16, 0.0 }
 0x1fa   :  { %v1732_v13 = vpop.f32.mrf.mxu1 }
 0x1fb   :  { %v404_v15 = vadd.f32 %v1732_v13, %v293_v61  ;;  %1757 = vmatprep.mubr.bf16.mxu0 %v455_v11  ;;  %v443_v21 = vmax.f32 %v393_v14, 0.0 }
 0x1fc   :  { %v395_v17 = vpop.f32.mrf.mxu1  ;;  %1758 = vmatmul.mubr.bf16.vlgmr.msra.gmra.mxu0 %v456_v12 }
 0x1fd   :  { %v396_v18 = vadd.f32 %v395_v17, %v293_v61  ;;  %v446_v19 = vmax.f32 %v404_v15, 0.0 }
 0x1fe   :  { %v1735_v20 = vpop.f32.mrf.mxu1 }
 0x1ff   :  { %v444_v22 = vmax.f32 %v396_v18, 0.0  ;;  %v458_v26 = vpack.c.bf16 %v446_v19, %v445_v23  ;;  %v417_v30 = vadd.f32 %v1735_v20, %v293_v61 }
 0x200   :  { %v408_v24 = vpop.f32.mrf.mxu1 }
 0x201   :  { %v457_v25 = vpack.c.bf16 %v444_v22, %v443_v21  ;;  %v409_v28 = vadd.f32 %v408_v24, %v293_v61  ;;  %v449_v37 = vmax.f32 %v417_v30, 0.0  ;;  %v2064_v22 = vmov 0.0  }
 0x202   :  { %v1736_v27 = vpop.f32.mrf.mxu1  ;;  %1805 = vmatprep.subr.bf16.mxu0 %v2064_v22 }
 0x203   :  { %v420_v29 = vadd.f32 %v1736_v27, %v293_v61  ;;  %1761 = vmatprep.mubr.bf16.mxu0 %v457_v25  ;;  %v447_v35 = vmax.f32 %v409_v28, 0.0 }
 0x204   :  { %v411_v31 = vpop.f32.mrf.mxu1  ;;  %1762 = vmatmul.mubr.bf16.gmra.mxu0 %v458_v26 }
 0x205   :  { %v412_v32 = vadd.f32 %v411_v31, %v293_v61  ;;  %v450_v33 = vmax.f32 %v420_v29, 0.0 }
 0x206   :  { %v1739_v34 = vpop.f32.mrf.mxu1 }
 0x207   :  { %v448_v36 = vmax.f32 %v412_v32, 0.0  ;;  %v460_v40 = vpack.c.bf16 %v450_v33, %v449_v37  ;;  %v433_v44 = vadd.f32 %v1739_v34, %v293_v61  ;;  %v635_v33 = vsub.s32 1, %v2173_v57 }
 0x208   :  { %v424_v38 = vpop.f32.mrf.mxu1 }
 0x209   :  { %v459_v39 = vpack.c.bf16 %v448_v36, %v447_v35  ;;  %v425_v42 = vadd.f32 %v424_v38, %v293_v61  ;;  %v453_v58 = vmax.f32 %v433_v44, 0.0  ;;  %v636_v36 = vrot.slane %v2179_v59, %v635_v33  ;;  %v1985_v33 = vld [vmem:[#allocation2 + $0xf8] sm:$0xff]  }
 0x20a   :  { %v1740_v41 = vpop.f32.mrf.mxu1 }
 0x20b   :  { %v436_v43 = vadd.f32 %v1740_v41, %v293_v61  ;;  %1765 = vmatprep.mubr.bf16.mxu0 %v459_v39  ;;  %v451_v55 = vmax.f32 %v425_v42, 0.0 }
 0x20c   :  { %v427_v45 = vpop.f32.mrf.mxu1  ;;  %1766 = vmatmul.mubr.bf16.gmra.mxu0 %v460_v40 }
 0x20d   :  { %v428_v53 = vadd.f32 %v427_v45, %v293_v61  ;;  %v454_v54 = vmax.f32 %v436_v43, 0.0 }
 0x20f   :  { %v452_v56 = vmax.f32 %v428_v53, 0.0  ;;  %v462_v62 = vpack.c.bf16 %v454_v54, %v453_v58 }
 0x211   :  { %v461_v60 = vpack.c.bf16 %v452_v56, %v451_v55 }
 0x213   :  { %1769 = vmatprep.mubr.bf16.mxu0 %v461_v60 }
 0x214   :  { %1770 = vmatmul.mubr.bf16.gmra.mxu0 %v462_v62 }
 0x215   :  { %1821 = vmatprep.mubr.msk.bf16.mxu0 %vm2065_vm0, %v2064_v22 }
 0x2bc   :  { %v1759_v63 = vpop.f32.mrf.mxu0 }
 0x2be   :  { %v562_v0 = vpop.f32.mrf.mxu0 }
 0x2c0   :  { %v1760_v1 = vpop.f32.mrf.mxu0 }
 0x2c1   :  { %v626_v20 = vpack.c.bf16 %v1760_v1, %v1759_v63 }
 0x2c2   :  { %v565_v2 = vpop.f32.mrf.mxu0 }
 0x2c3   :  { %v625_v21 = vpack.c.bf16 %v565_v2, %v562_v0 }
 0x2c4   :  { %v1763_v3 = vpop.f32.mrf.mxu0 }
 0x2c6   :  { %v578_v4 = vpop.f32.mrf.mxu0 }
 0x2c8   :  { %v1764_v5 = vpop.f32.mrf.mxu0 }
 0x2c9   :  { %v628_v18 = vpack.c.bf16 %v1764_v5, %v1763_v3 }
 0x2ca   :  { %v581_v6 = vpop.f32.mrf.mxu0 }
 0x2cb   :  { %v627_v19 = vpack.c.bf16 %v581_v6, %v578_v4 }
 0x2cc   :  { %v1767_v7 = vpop.f32.mrf.mxu0 }
 0x2ce   :  { %v594_v8 = vpop.f32.mrf.mxu0 }
 0x2d0   :  { %v1768_v9 = vpop.f32.mrf.mxu0 }
 0x2d1   :  { %v630_v16 = vpack.c.bf16 %v1768_v9, %v1767_v7 }
 0x2d2   :  { %v597_v61 = vpop.f32.mrf.mxu0 }
 0x2d3   :  { %v629_v17 = vpack.c.bf16 %v597_v61, %v594_v8 }
 0x2d4   :  { %v1771_v10 = vpop.f32.mrf.mxu0 }
 0x2d6   :  { %v610_v11 = vpop.f32.mrf.mxu0 }
 0x2d8   :  { %v1772_v12 = vpop.f32.mrf.mxu0 }
 0x2d9   :  { %v632_v13 = vpack.c.bf16 %v1772_v12, %v1771_v10 }
 0x2da   :  { %v613_v14 = vpop.f32.mrf.mxu0 }
 0x2db   :  { %v631_v15 = vpack.c.bf16 %v613_v14, %v610_v11  ;;  %1773 = vmatprep.subr.bf16.mxu1 %v632_v13 }
 0x2dc   :  { %1774 = vmatpush3.bf16.msra.mxu1 %v632_v13 }
 0x2dd   :  { %1775 = vmatprep.subr.bf16.mxu1 %v631_v15 }
 0x2e0   :  { %1776 = vmatpush3.bf16.msra.mxu1 %v631_v15 }
 0x2e1   :  { %1777 = vmatprep.subr.bf16.mxu1 %v630_v16 }
 0x2e4   :  { %1778 = vmatpush3.bf16.msra.mxu1 %v630_v16 }
 0x2e5   :  { %1779 = vmatprep.subr.bf16.mxu1 %v629_v17 }
 0x2e8   :  { %1780 = vmatpush3.bf16.msra.mxu1 %v629_v17 }
 0x2e9   :  { %1781 = vmatprep.subr.bf16.mxu1 %v628_v18 }
 0x2ec   :  { %1782 = vmatpush3.bf16.msra.mxu1 %v628_v18 }
 0x2ed   :  { %1783 = vmatprep.subr.bf16.mxu1 %v627_v19 }
 0x2f0   :  { %1784 = vmatpush3.bf16.msra.mxu1 %v627_v19 }
 0x2f1   :  { %1785 = vmatprep.subr.bf16.mxu1 %v626_v20 }
 0x2f4   :  { %1786 = vmatpush3.bf16.msra.mxu1 %v626_v20 }
 0x2f5   :  { %1787 = vmatprep.subr.bf16.mxu1 %v625_v21 }
 0x2f8   :  { %1788 = vmatpush3.bf16.msra.mxu1 %v625_v21 }
 0x2f9   :  { %1825 = vmatprep.subr.bf16.mxu1 %v2064_v22 }
 0x2fb   :  { %1790 = vmatmul.mubr.bf16.vlgmr.msra.gmra.mxu1 %v2133_v46  ;;  %v1976_v46 = vld [vmem:[#allocation2 + $0xb8] sm:$0xff]  }
 0x2fc   :  { %1793 = vmatprep.mubr.bf16.mxu1 %v2138_v47  ;;  %1826 = vmatpush3.bf16.msra.mxu1 %v1976_v46  ;;  %v1977_v47 = vld [vmem:[#allocation2 + $0xb0] sm:$0xff]  }
 0x2fd   :  { %1827 = vmatprep.subr.bf16.mxu1 %v2064_v22 }
 0x300   :  { %1828 = vmatpush3.bf16.msra.mxu1 %v1977_v47 }
 0x301   :  { %1829 = vmatprep.subr.bf16.mxu1 %v2064_v22 }
 0x303   :  { %1794 = vmatmul.mubr.bf16.gmra.mxu1 %v2145_v48  ;;  %v1978_v48 = vld [vmem:[#allocation2 + $0xa8] sm:$0xff]  }
 0x304   :  { %1797 = vmatprep.mubr.bf16.mxu1 %v2150_v49  ;;  %1830 = vmatpush3.bf16.msra.mxu1 %v1978_v48  ;;  %v1979_v49 = vld [vmem:[#allocation2 + $0xa0] sm:$0xff]  }
 0x305   :  { %1831 = vmatprep.subr.bf16.mxu1 %v2064_v22 }
 0x308   :  { %1832 = vmatpush3.bf16.msra.mxu1 %v1979_v49  ;;  %v1975_v49 = vld [vmem:[%s2278_s2] sm:$0xff]  }
 0x309   :  { %1833 = vmatprep.subr.bf16.mxu1 %v2064_v22 }
 0x30b   :  { %1798 = vmatmul.mubr.bf16.gmra.mxu1 %v2157_v50  ;;  %v1980_v50 = vld [vmem:[#allocation2 + $0x98] sm:$0xff]  }
 0x30c   :  { %1801 = vmatprep.mubr.bf16.mxu1 %v2162_v51  ;;  %1834 = vmatpush3.bf16.msra.mxu1 %v1980_v50  ;;  %v1981_v51 = vld [vmem:[#allocation2 + $0x90] sm:$0xff]   ;;  %v1982_v50 = vld [vmem:[#allocation2 + $0x88] sm:$0xff]  }
 0x30d   :  { %1835 = vmatprep.subr.bf16.mxu1 %v2064_v22 }
 0x310   :  { %1836 = vmatpush3.bf16.msra.mxu1 %v1981_v51  ;;  %v1983_v51 = vld [vmem:[#allocation2 + $0x80] sm:$0xff]  }
 0x311   :  { %1837 = vmatprep.subr.bf16.mxu1 %v2064_v22 }
 0x313   :  { %1802 = vmatmul.mubr.bf16.gmra.mxu1 %v2169_v52 }
 0x314   :  { %1841 = vmatprep.mubr.msk.bf16.mxu1 %vm2065_vm0, %v2064_v22  ;;  %1838 = vmatpush3.bf16.msra.mxu1 %v1982_v50  ;;  %v2006_v50 = vld [vmem:[#allocation2 + $0x150] sm:$0xff]  }
 0x315   :  { %1839 = vmatprep.subr.bf16.mxu1 %v2064_v22 }
 0x318   :  { %1840 = vmatpush3.bf16.msra.mxu1 %v1983_v51  ;;  %v2007_v51 = vld [vmem:[#allocation2 + $0x148] sm:$0xff]  }
 0x319   :  { %1845 = vmatprep.subr.bf16.mxu1 %v2064_v22 }
 0x3bb   :  { %v1791_v52 = vpop.f32.mrf.mxu1 }
 0x3bc   :  { %v680_v14 = vadd.f32 %v1791_v52, %v636_v36 }
 0x3bd   :  { %v671_v23 = vpop.f32.mrf.mxu1 }
 0x3be   :  { %v736_v19 = vmax.f32 %v680_v14, 0.0  ;;  %v672_v20 = vadd.f32 %v671_v23, %v636_v36 }
 0x3bf   :  { %v1792_v24 = vpop.f32.mrf.mxu1 }
 0x3c0   :  { %v683_v11 = vadd.f32 %v1792_v24, %v636_v36  ;;  %v734_v47 = vmax.f32 %v672_v20, 0.0 }
 0x3c1   :  { %v674_v25 = vpop.f32.mrf.mxu1 }
 0x3c2   :  { %v737_v16 = vmax.f32 %v683_v11, 0.0  ;;  %v675_v17 = vadd.f32 %v674_v25, %v636_v36  ;;  %v1079_v11 = vsub.s32 3, %v2173_v57 }
 0x3c3   :  { %v1795_v26 = vpop.f32.mrf.mxu1 }
 0x3c4   :  { %v696_v5 = vadd.f32 %v1795_v26, %v636_v36  ;;  %v751_v21 = vpack.c.bf16 %v737_v16, %v736_v19  ;;  %v735_v46 = vmax.f32 %v675_v17, 0.0 }
 0x3c5   :  { %v687_v27 = vpop.f32.mrf.mxu1 }
 0x3c6   :  { %v740_v61 = vmax.f32 %v696_v5, 0.0  ;;  %v688_v10 = vadd.f32 %v687_v27, %v636_v36  ;;  %v750_v48 = vpack.c.bf16 %v735_v46, %v734_v47  ;;  %v1995_v5 = vld [vmem:[#allocation2 + $0x128] sm:$0xff]   ;;  %v2002_v46 = vld [vmem:[#allocation2 + $0x170] sm:$0xff]  }
 0x3c7   :  { %v1796_v28 = vpop.f32.mrf.mxu1  ;;  %v2003_v47 = vld [vmem:[#allocation2 + $0x168] sm:$0xff]  }
 0x3c8   :  { %v699_v2 = vadd.f32 %v1796_v28, %v636_v36  ;;  %v738_v15 = vmax.f32 %v688_v10, 0.0  ;;  %v2001_v10 = vld [vmem:[#allocation2 + $0x178] sm:$0xff]  }
 0x3c9   :  { %v690_v29 = vpop.f32.mrf.mxu1 }
 0x3ca   :  { %v741_v7 = vmax.f32 %v699_v2, 0.0  ;;  %v691_v8 = vadd.f32 %v690_v29, %v636_v36 }
 0x3cb   :  { %v1799_v30 = vpop.f32.mrf.mxu1 }
 0x3cc   :  { %v712_v56 = vadd.f32 %v1799_v30, %v636_v36  ;;  %v753_v12 = vpack.c.bf16 %v741_v7, %v740_v61  ;;  %v739_v13 = vmax.f32 %v691_v8, 0.0  ;;  %v1997_v7 = vld [vmem:[#allocation2 + $0x118] sm:$0xff]   ;;  %v1998_v8 = vld [vmem:[#allocation2 + $0x110] sm:$0xff]   ;;  %v2000_v61 = vld [vmem:[#allocation2 + $0x100] sm:$0xff]  }
 0x3cd   :  { %v703_v31 = vpop.f32.mrf.mxu1 }
 0x3ce   :  { %v744_v0 = vmax.f32 %v712_v56, 0.0  ;;  %v704_v1 = vadd.f32 %v703_v31, %v636_v36  ;;  %v752_v18 = vpack.c.bf16 %v739_v13, %v738_v15 }
 0x3cf   :  { %v1800_v32 = vpop.f32.mrf.mxu1 }
 0x3d0   :  { %v715_v53 = vadd.f32 %v1800_v32, %v636_v36  ;;  %v742_v6 = vmax.f32 %v704_v1, 0.0  ;;  %v1984_v32 = vld [vmem:[%s2278_s2 + $0x8] sm:$0xff]   ;;  %s2066_s2 = smov [#allocation5]  }
 0x3d1   :  { %v706_v34 = vpop.f32.mrf.mxu1  ;;  %s1470_s8 = sshll.u32 %s2066_s2, 4  ;;  %s1471_s8 = int_to_ptr.vmem [resolvable:$true] %s1470_s8 }
 0x3d2   :  { %v745_v60 = vmax.f32 %v715_v53, 0.0  ;;  %v707_v62 = vadd.f32 %v706_v34, %v636_v36  ;;  %v1986_v34 = vld [vmem:[#allocation2 + $0xf0] sm:$0xff]   ;;  %s2037_s9 = scalar_lea.vmem %s1471_s8, 16  ;;  %s2041_s10 = scalar_lea.vmem %s1471_s8, 32 }
 0x3d3   :  { %v1803_v35 = vpop.f32.mrf.mxu1  ;;  %p2038_p5 = scmp.ne.s32.totalorder %s1471_s8, %s2037_s9  ;;  %p2042_p6 = scmp.lt.s32.totalorder %s1471_s8, %s1471_s8 }
 0x3d4   :  { %v728_v38 = vadd.f32 %v1803_v35, %v636_v36  ;;  %v755_v3 = vpack.c.bf16 %v745_v60, %v744_v0  ;;  %v743_v4 = vmax.f32 %v707_v62, 0.0  ;;  %v1987_v35 = vld [vmem:[#allocation2 + $0xe8] sm:$0xff]   ;;  %p2043_p7 = scmp.lt.s32.totalorder %s2041_s10, %s2037_s9 }
 0x3d5   :  { %v719_v37 = vpop.f32.mrf.mxu1 }
 0x3d6   :  { %v748_v42 = vmax.f32 %v728_v38, 0.0  ;;  %v720_v43 = vadd.f32 %v719_v37, %v636_v36  ;;  %v754_v9 = vpack.c.bf16 %v743_v4, %v742_v6  ;;  %v1989_v37 = vld [vmem:[#allocation2 + $0xd8] sm:$0xff]   ;;  %v1990_v38 = vld [vmem:[#allocation2 + $0xd0] sm:$0xff]   ;;  %v1996_v6 = vld [vmem:[#allocation2 + $0x120] sm:$0xff]   ;;  %p2044_p8 = por %p2043_p7, %p2042_p6 }
 0x3d7   :  { %v1804_v39 = vpop.f32.mrf.mxu1  ;;  %v1994_v4 = vld [vmem:[#allocation2 + $0x130] sm:$0xff]  }
 0x3d8   :  { %v731_v40 = vadd.f32 %v1804_v39, %v636_v36  ;;  %v746_v58 = vmax.f32 %v720_v43, 0.0  ;;  %v1991_v39 = vld [vmem:[#allocation2 + $0xc8] sm:$0xff]   ;;  %p2045_p9 = pnand %p2044_p8, %p2038_p5 }
 0x3d9   :  { %v722_v41 = vpop.f32.mrf.mxu1 }
 0x3da   :  { %v749_v44 = vmax.f32 %v731_v40, 0.0  ;;  %v723_v45 = vadd.f32 %v722_v41, %v636_v36  ;;  %v1988_v36 = vld [vmem:[#allocation2 + $0xe0] sm:$0xff]   ;;  %v915_v41 = vsub.s32 2, %v2173_v57 }
 0x3db   :  { %v1992_v40 = vld [vmem:[#allocation2 + $0xc0] sm:$0xff]  }
 0x3dc   :  { %v757_v54 = vpack.c.bf16 %v749_v44, %v748_v42  ;;  %v747_v55 = vmax.f32 %v723_v45, 0.0  ;;  %v916_v42 = vrot.slane %v2179_v59, %v915_v41 }
 0x3de   :  { %1806 = vmatpush3.bf16.msra.mxu0 %v757_v54  ;;  %v756_v63 = vpack.c.bf16 %v747_v55, %v746_v58 }
 0x3df   :  { %1807 = vmatprep.subr.bf16.mxu0 %v2064_v22 }
 0x3e2   :  { %1808 = vmatpush3.bf16.msra.mxu0 %v756_v63 }
 0x3e3   :  { %1809 = vmatprep.subr.bf16.mxu0 %v2064_v22 }
 0x3e6   :  { %1810 = vmatpush3.bf16.msra.mxu0 %v755_v3  ;;  %v1993_v3 = vld [vmem:[#allocation2 + $0x138] sm:$0xff]  }
 0x3e7   :  { %1811 = vmatprep.subr.bf16.mxu0 %v2064_v22 }
 0x3ea   :  { %1812 = vmatpush3.bf16.msra.mxu0 %v754_v9  ;;  %v1999_v9 = vld [vmem:[#allocation2 + $0x108] sm:$0xff]  }
 0x3eb   :  { %1813 = vmatprep.subr.bf16.mxu0 %v2064_v22 }
 0x3ee   :  { %1814 = vmatpush3.bf16.msra.mxu0 %v753_v12  ;;  %v1080_v12 = vrot.slane %v2179_v59, %v1079_v11 }
 0x3ef   :  { %1815 = vmatprep.subr.bf16.mxu0 %v2064_v22 }
 0x3f2   :  { %1816 = vmatpush3.bf16.msra.mxu0 %v752_v18 }
 0x3f3   :  { %1817 = vmatprep.subr.bf16.mxu0 %v2064_v22 }
 0x3f6   :  { %1818 = vmatpush3.bf16.msra.mxu0 %v751_v21 }
 0x3f7   :  { %1819 = vmatprep.subr.bf16.mxu0 %v2064_v22 }
 0x3fa   :  { %1820 = vmatpush3.bf16.msra.mxu0 %v750_v48  ;;  %v2004_v48 = vld [vmem:[#allocation2 + $0x160] sm:$0xff]  }
 0x3fb   :  { %1871 = vmatprep.subr.bf16.mxu0 %v2064_v22 }
 0x3fd   :  { %1822 = vmatmul.mubr.bf16.vlgmr.msra.gmra.mxu0 %v1975_v49  ;;  %v2005_v49 = vld [vmem:[#allocation2 + $0x158] sm:$0xff]  }
 0x3fe   :  { %1873 = vmatprep.mubr.msk.bf16.mxu0 %vm2065_vm0, %v2064_v22 }
 0x4bd   :  { %v798_v52 = vpop.f32.mrf.mxu0 }
 0x4bf   :  { %v1823_v23 = vpop.f32.mrf.mxu0 }
 0x4c0   :  { %v2009_v23 = vld [vmem:[#allocation2 + $0x1b8] sm:$0xff]  }
 0x4c1   :  { %v801_v24 = vpop.f32.mrf.mxu0 }
 0x4c2   :  { %v805_v25 = vpack.c.bf16 %v801_v24, %v798_v52  ;;  %v2008_v52 = vld [vmem:[#allocation2 + $0x140] sm:$0xff]   ;;  %v2010_v24 = vld [vmem:[#allocation2 + $0x1b0] sm:$0xff]  }
 0x4c3   :  { %v1824_v26 = vpop.f32.mrf.mxu0 }
 0x4c4   :  { %1842 = vmatmul.mubr.bf16.vlgmr.msra.gmra.mxu1 %v805_v25  ;;  %v2011_v25 = vld [vmem:[#allocation2 + $0x1a8] sm:$0xff]   ;;  %v2012_v26 = vld [vmem:[#allocation2 + $0x1a0] sm:$0xff]  }
 0x4c5   :  { %1847 = vmatprep.mubr.msk.bf16.mxu1 %vm2065_vm0, %v2064_v22 }
 0x584   :  { %v905_v27 = vpop.f32.mrf.mxu1 }
 0x586   :  { %v1843_v28 = vpop.f32.mrf.mxu1 }
 0x587   :  { %v2014_v28 = vld [vmem:[#allocation2 + $0x190] sm:$0xff]  }
 0x588   :  { %v908_v29 = vpop.f32.mrf.mxu1 }
 0x589   :  { %v912_v30 = vpack.c.bf16 %v908_v29, %v905_v27  ;;  %v2013_v27 = vld [vmem:[#allocation2 + $0x198] sm:$0xff]   ;;  %v1144_v29 = vsub.s32 4, %v2173_v57  ;;  %v2015_v57 = vld [vmem:[#allocation2 + $0x188] sm:$0xff]  }
 0x58a   :  { %v1844_v31 = vpop.f32.mrf.mxu1 }
 0x58b   :  { %1846 = vmatpush3.bf16.msra.mxu1 %v912_v30  ;;  %v1145_v30 = vrot.slane %v2179_v59, %v1144_v29 }
 0x58c   :  { %1851 = vmatprep.subr.bf16.mxu1 %v2064_v22 }
 0x58e   :  { %1848 = vmatmul.mubr.msk.bf16.vlgmr.msra.gmra.mxu1 %vm922_vm1, %v1984_v32 }
 0x58f   :  { %1852 = vmatpush3.bf16.msra.mxu1 %v1985_v33  ;;  %1867 = vmatprep.mubr.msk.bf16.mxu1 %vm2065_vm0, %v2064_v22 }
 0x590   :  { %1853 = vmatprep.subr.bf16.mxu1 %v2064_v22 }
 0x593   :  { %1854 = vmatpush3.bf16.msra.mxu1 %v1986_v34 }
 0x594   :  { %1855 = vmatprep.subr.bf16.mxu1 %v2064_v22 }
 0x597   :  { %1856 = vmatpush3.bf16.msra.mxu1 %v1987_v35 }
 0x598   :  { %1857 = vmatprep.subr.bf16.mxu1 %v2064_v22 }
 0x59b   :  { %1858 = vmatpush3.bf16.msra.mxu1 %v1988_v36 }
 0x59c   :  { %1859 = vmatprep.subr.bf16.mxu1 %v2064_v22 }
 0x59f   :  { %1860 = vmatpush3.bf16.msra.mxu1 %v1989_v37 }
 0x5a0   :  { %1861 = vmatprep.subr.bf16.mxu1 %v2064_v22 }
 0x5a3   :  { %1862 = vmatpush3.bf16.msra.mxu1 %v1990_v38 }
 0x5a4   :  { %1863 = vmatprep.subr.bf16.mxu1 %v2064_v22 }
 0x5a7   :  { %1864 = vmatpush3.bf16.msra.mxu1 %v1991_v39 }
 0x5a8   :  { %1865 = vmatprep.subr.bf16.mxu1 %v2064_v22 }
 0x5ab   :  { %1866 = vmatpush3.bf16.msra.mxu1 %v1992_v40 }
 0x5ac   :  { %1897 = vmatprep.subr.bf16.mxu1 %v2064_v22 }
 0x64e   :  { %v960_v43 = vpop.f32.mrf.mxu1 }
 0x64f   :  { %v961_v45 = vadd.f32 %v960_v43, %v916_v42 }
 0x650   :  { %v1849_v44 = vpop.f32.mrf.mxu1 }
 0x651   :  { %v967_v56 = vmax.f32 %v961_v45, 0.0 }
 0x652   :  { %v963_v53 = vpop.f32.mrf.mxu1 }
 0x653   :  { %v964_v54 = vadd.f32 %v963_v53, %v916_v42 }
 0x654   :  { %v1850_v55 = vpop.f32.mrf.mxu1 }
 0x655   :  { %v968_v58 = vmax.f32 %v964_v54, 0.0  ;;  %v2016_v55 = vld [vmem:[#allocation2 + $0x180] sm:$0xff]  }
 0x657   :  { %v969_v60 = vpack.c.bf16 %v968_v58, %v967_v56  ;;  %v1312_v56 = vrot.slane %v2179_v59, 5 }
 0x659   :  { %1868 = vmatmul.mubr.bf16.vlgmr.msra.gmra.mxu1 %v969_v60 }
 0x65a   :  { %1913 = vmatprep.mubr.msk.bf16.mxu1 %vm2065_vm0, %v2064_v22  ;;  %1898 = vmatpush3.bf16.msra.mxu1 %v2001_v10 }
 0x65b   :  { %1899 = vmatprep.subr.bf16.mxu1 %v2064_v22 }
 0x65e   :  { %1900 = vmatpush3.bf16.msra.mxu1 %v2002_v46 }
 0x65f   :  { %1901 = vmatprep.subr.bf16.mxu1 %v2064_v22 }
 0x662   :  { %1902 = vmatpush3.bf16.msra.mxu1 %v2003_v47 }
 0x663   :  { %1903 = vmatprep.subr.bf16.mxu1 %v2064_v22 }
 0x666   :  { %1904 = vmatpush3.bf16.msra.mxu1 %v2004_v48 }
 0x667   :  { %1905 = vmatprep.subr.bf16.mxu1 %v2064_v22 }
 0x66a   :  { %1906 = vmatpush3.bf16.msra.mxu1 %v2005_v49 }
 0x66b   :  { %1907 = vmatprep.subr.bf16.mxu1 %v2064_v22 }
 0x66e   :  { %1908 = vmatpush3.bf16.msra.mxu1 %v2006_v50 }
 0x66f   :  { %1909 = vmatprep.subr.bf16.mxu1 %v2064_v22 }
 0x672   :  { %1910 = vmatpush3.bf16.msra.mxu1 %v2007_v51 }
 0x673   :  { %1911 = vmatprep.subr.bf16.mxu1 %v2064_v22 }
 0x676   :  { %1912 = vmatpush3.bf16.msra.mxu1 %v2008_v52 }
 0x719   :  { %v1069_v62 = vpop.f32.mrf.mxu1 }
 0x71b   :  { %v1869_v63 = vpop.f32.mrf.mxu1 }
 0x71d   :  { %v1072_v0 = vpop.f32.mrf.mxu1 }
 0x71e   :  { %v1076_v1 = vpack.c.bf16 %v1072_v0, %v1069_v62 }
 0x71f   :  { %v1870_v2 = vpop.f32.mrf.mxu1 }
 0x720   :  { %1872 = vmatpush3.bf16.msra.mxu0 %v1076_v1 }
 0x721   :  { %1877 = vmatprep.subr.bf16.mxu0 %v2064_v22 }
 0x723   :  { %1874 = vmatmul.mubr.msk.bf16.vlgmr.msra.gmra.mxu0 %vm922_vm1, %v1984_v32 }
 0x724   :  { %1878 = vmatpush3.bf16.msra.mxu0 %v1993_v3  ;;  %1893 = vmatprep.mubr.msk.bf16.mxu0 %vm2065_vm0, %v2064_v22  ;;  %v1421_v3 = vrot.slane %v2179_v59, 6 }
 0x725   :  { %1879 = vmatprep.subr.bf16.mxu0 %v2064_v22 }
 0x728   :  { %1880 = vmatpush3.bf16.msra.mxu0 %v1994_v4 }
 0x729   :  { %1881 = vmatprep.subr.bf16.mxu0 %v2064_v22 }
 0x72c   :  { %1882 = vmatpush3.bf16.msra.mxu0 %v1995_v5 }
 0x72d   :  { %1883 = vmatprep.subr.bf16.mxu0 %v2064_v22 }
 0x730   :  { %1884 = vmatpush3.bf16.msra.mxu0 %v1996_v6 }
 0x731   :  { %1885 = vmatprep.subr.bf16.mxu0 %v2064_v22 }
 0x734   :  { %1886 = vmatpush3.bf16.msra.mxu0 %v1997_v7 }
 0x735   :  { %1887 = vmatprep.subr.bf16.mxu0 %v2064_v22 }
 0x738   :  { %1888 = vmatpush3.bf16.msra.mxu0 %v1998_v8 }
 0x739   :  { %1889 = vmatprep.subr.bf16.mxu0 %v2064_v22 }
 0x73c   :  { %1890 = vmatpush3.bf16.msra.mxu0 %v1999_v9 }
 0x73d   :  { %1891 = vmatprep.subr.bf16.mxu0 %v2064_v22 }
 0x740   :  { %1892 = vmatpush3.bf16.msra.mxu0 %v2000_v61 }
 0x741   :  { %1917 = vmatprep.subr.bf16.mxu0 %v2064_v22 }
 0x7e3   :  { %v1115_v13 = vpop.f32.mrf.mxu0 }
 0x7e4   :  { %v1116_v15 = vadd.f32 %v1115_v13, %v1080_v12 }
 0x7e5   :  { %v1875_v14 = vpop.f32.mrf.mxu0 }
 0x7e6   :  { %v1122_v19 = vmax.f32 %v1116_v15, 0.0 }
 0x7e7   :  { %v1118_v16 = vpop.f32.mrf.mxu0 }
 0x7e8   :  { %v1119_v17 = vadd.f32 %v1118_v16, %v1080_v12 }
 0x7e9   :  { %v1876_v18 = vpop.f32.mrf.mxu0 }
 0x7ea   :  { %v1123_v20 = vmax.f32 %v1119_v17, 0.0 }
 0x7ec   :  { %v1124_v21 = vpack.c.bf16 %v1123_v20, %v1122_v19 }
 0x7ee   :  { %1894 = vmatmul.mubr.bf16.vlgmr.msra.gmra.mxu0 %v1124_v21 }
 0x7ef   :  { %1933 = vmatprep.mubr.msk.bf16.mxu0 %vm2065_vm0, %v2064_v22  ;;  %1918 = vmatpush3.bf16.msra.mxu0 %v2009_v23 }
 0x7f0   :  { %1919 = vmatprep.subr.bf16.mxu0 %v2064_v22 }
 0x7f3   :  { %1920 = vmatpush3.bf16.msra.mxu0 %v2010_v24 }
 0x7f4   :  { %1921 = vmatprep.subr.bf16.mxu0 %v2064_v22 }
 0x7f7   :  { %1922 = vmatpush3.bf16.msra.mxu0 %v2011_v25 }
 0x7f8   :  { %1923 = vmatprep.subr.bf16.mxu0 %v2064_v22 }
 0x7fb   :  { %1924 = vmatpush3.bf16.msra.mxu0 %v2012_v26 }
 0x7fc   :  { %1925 = vmatprep.subr.bf16.mxu0 %v2064_v22 }
 0x7ff   :  { %1926 = vmatpush3.bf16.msra.mxu0 %v2013_v27 }
 0x800   :  { %1927 = vmatprep.subr.bf16.mxu0 %v2064_v22 }
 0x803   :  { %1928 = vmatpush3.bf16.msra.mxu0 %v2014_v28 }
 0x804   :  { %1929 = vmatprep.subr.bf16.mxu0 %v2064_v22 }
 0x807   :  { %1930 = vmatpush3.bf16.msra.mxu0 %v2015_v57 }
 0x808   :  { %1931 = vmatprep.subr.bf16.mxu0 %v2064_v22 }
 0x80b   :  { %1932 = vmatpush3.bf16.msra.mxu0 %v2016_v55 }
 0x8ae   :  { %v1228_v31 = vpop.f32.mrf.mxu0 }
 0x8af   :  { %v1229_v33 = vadd.f32 %v1228_v31, %v1145_v30 }
 0x8b0   :  { %v1895_v32 = vpop.f32.mrf.mxu0 }
 0x8b1   :  { %v1235_v37 = vmax.f32 %v1229_v33, 0.0 }
 0x8b2   :  { %v1231_v34 = vpop.f32.mrf.mxu0 }
 0x8b3   :  { %v1232_v35 = vadd.f32 %v1231_v34, %v1145_v30 }
 0x8b4   :  { %v1896_v36 = vpop.f32.mrf.mxu0 }
 0x8b5   :  { %v1236_v38 = vmax.f32 %v1232_v35, 0.0 }
 0x8b7   :  { %v1237_v39 = vadd.f32 %v1236_v38, %v1235_v37 }
 0x8b9   :  { %v1238_v40 = vrot.slane %v1237_v39, 4 }
 0x8bb   :  { %v1239_v41 = vadd.f32 %v1238_v40, %v1237_v39 }
 0x8bd   :  { %v1240_v42 = vrot.slane %v1239_v41, 2 }
 0x8bf   :  { %v1241_v43 = vadd.f32 %v1240_v42, %v1239_v41 }
 0x8c1   :  { %v1242_v44 = vrot.slane %v1241_v43, 1 }
 0x8c3   :  { %v1243_v45 = vadd.f32 %v1242_v44, %v1241_v43 }
 0x8c5   :  { %v1244_v53 = vmul.f32 0.0625, %v1243_v45 }
 0x8c7   :  { %v1245_v54 = vpack.c.bf16 %v1244_v53, %v1244_v53 }
 0x8c9   :  { %1914 = vmatmul.mubr.bf16.vlgmr.msra.gmra.mxu1 %v1245_v54 }
 0x989   :  { %v1348_v58 = vpop.f32.mrf.mxu1 }
 0x98a   :  { %v1349_v60 = vadd.f32 %v1348_v58, %v1312_v56 }
 0x98b   :  { %v1915_v62 = vpop.f32.mrf.mxu1 }
 0x98c   :  { %v1354_v63 = vmax.f32 %v1349_v60, 0.0 }
 0x98d   :  { %v1351_v0 = vpop.f32.mrf.mxu1 }
 0x98e   :  { %v1355_v1 = vpack.c.bf16 %v1354_v63, %v1354_v63 }
 0x98f   :  { %v1916_v2 = vpop.f32.mrf.mxu1 }
 0x990   :  { %1934 = vmatmul.mubr.bf16.vlgmr.msra.gmra.mxu0 %v1355_v1 }
 0xa50   :  { %v1457_v4 = vpop.f32.mrf.mxu0 }
 0xa51   :  { %v1458_v5 = vadd.f32 %v1457_v4, %v1421_v3 }
 0xa52   :  { %v1935_v22 = vpop.f32.mrf.mxu0 }
 0xa53   :  { %1463 = vst [vmem:[#allocation5] sm:$0x1] %v1458_v5 }
 0xa54   :  { %v1460_v6 = vpop.f32.mrf.mxu0 }
 0xa55   :  { %2048 = shalt.err (!%p2045_p9)
}
 0xa56   :  { %1473 = dma.vmem_to_hbm [thread:$0]  %s1471_s8, 16, %s2281_s5, [#allocation4]   ;;  %v1936_v59 = vpop.f32.mrf.mxu0 }
 0xa57   :  { %2059 = dma.done.wait [#allocation4], 16  }
 0xa58   :  { %2060 = vsyncadd [#allocation4], 4294967280 }
 0xa59   :  { %1477 = vsyncpa [#allocation3], 1 }
 0xa5a   :  { %1478 = vsyncpa [#allocation4], 1 }

</bundles_post_ra>
